<compile_context>
chip_gen: v6e
topology: v6e:2x2x1
jax: 0.10.0
libtpu: 0.0.40
codegen_flags: <defaults>
</compile_context>

<pallas_src>
import functools

import jax
import jax.numpy as jnp
from jax import lax
from jax.experimental import pallas as pl
from jax.experimental.pallas import tpu as pltpu


def _round_up(x, m):
    return ((x + m - 1) // m) * m


def _cdiv(a, b):
    return (a + b - 1) // b


def _mlp_kernel(x_ref,
                w1_ref, b1_ref,
                w2_ref, b2_ref,
                w3_ref, b3_ref,
                w4_ref, b4_ref,
                o_ref,
                *, chunk_b, n_chunks, mxu_dtype):
    """Fused 4-layer MLP with tanh activations for one (packed) batch tile.

    The grid block (tile_b packed rows) is large to amortize per-step DMA/grid
    overhead; compute iterates over `chunk_b`-row chunks to cap vreg pressure.
    Weights/biases use a constant index_map so they stay resident in VMEM.
    """
    # Hoist weight/bias loads (and the optional bf16 cast) out of the chunk loop.
    w1 = w1_ref[...].astype(mxu_dtype); b1 = b1_ref[...]
    w2 = w2_ref[...].astype(mxu_dtype); b2 = b2_ref[...]
    w3 = w3_ref[...].astype(mxu_dtype); b3 = b3_ref[...]
    w4 = w4_ref[...].astype(mxu_dtype); b4 = b4_ref[...]

    def body(c, carry):
        row = pl.multiple_of(c * chunk_b, chunk_b)
        x = x_ref[pl.ds(row, chunk_b), :].astype(mxu_dtype)
        # f32 accumulation on the MXU; tanh/bias math stays f32 (v5e-safe).
        h = jnp.tanh(jnp.dot(x, w1, preferred_element_type=jnp.float32) + b1)
        h = jnp.tanh(jnp.dot(h.astype(mxu_dtype), w2,
                             preferred_element_type=jnp.float32) + b2)
        h = jnp.tanh(jnp.dot(h.astype(mxu_dtype), w3,
                             preferred_element_type=jnp.float32) + b3)
        out = jnp.dot(h.astype(mxu_dtype), w4,
                      preferred_element_type=jnp.float32) + b4
        # Narrow store: out width equals the full (unpadded) array dim.
        o_ref[pl.ds(row, chunk_b), :] = out.astype(o_ref.dtype)
        return carry

    lax.fori_loop(0, n_chunks, body, 0, unroll=True)


def physics_informed_nn_forward(x, params, *, tile_b=2048, chunk_b=128,
                                pack=None, mxu_dtype=jnp.float32):
    """Fused MLP as a single pallas_call, tiled over the (row-packed) batch dim."""
    (w1, b1), (w2, b2), (w3, b3), (w4, b4) = params
    B, input_dim = x.shape
    hidden_dim = w1.shape[1]
    output_dim = w4.shape[1]

    # --- block-diagonal row packing -----------------------------------------
    # hidden_dim=32 only fills 32 of 128 lanes per vreg/MXU push. Pack `pack`
    # batch rows into one packed row and replicate weights block-diagonally so
    # every vmatmul / tanh vreg carries `pack` samples at once.
    if pack is None:
        pack = max(1, min(8, 128 // max(1, hidden_dim)))

    eye = jnp.eye(pack, dtype=w1.dtype)
    w1p = jnp.kron(eye, w1); b1p = jnp.tile(b1, (1, pack))
    w2p = jnp.kron(eye, w2); b2p = jnp.tile(b2, (1, pack))
    w3p = jnp.kron(eye, w3); b3p = jnp.tile(b3, (1, pack))
    w4p = jnp.kron(eye, w4); b4p = jnp.tile(b4, (1, pack))

    in_p = pack * input_dim
    hid_p = pack * hidden_dim
    out_p = pack * output_dim

    # --- tile sizing (in packed rows) ----------------------------------------
    bp = _cdiv(B, pack)
    bp8 = _round_up(bp, 8)
    # Keep >= 2 grid steps when the batch allows, so both v7x TensorCores get
    # work from the "parallel" grid axis (no-op cost on v5e/v6e).
    if bp8 >= 16:
        tile_b = min(tile_b, _round_up(_cdiv(bp8, 2), 8))
    tile_b = _round_up(min(tile_b, bp8), 8)
    chunk_b = min(chunk_b, tile_b)
    if tile_b % chunk_b != 0:
        chunk_b = tile_b
    n_chunks = tile_b // chunk_b

    # --- ragged batch handling -----------------------------------------------
    bp_pad = _round_up(bp, tile_b)
    b_pad = bp_pad * pack
    if b_pad != B:
        x = jnp.pad(x, ((0, b_pad - B), (0, 0)))
    xp = x.reshape(bp_pad, in_p)

    grid = (bp_pad // tile_b,)

    def resident(shape):
        # Whole array as one block, constant index_map => stays in VMEM.
        return pl.BlockSpec(shape, lambda i: (0, 0))

    kernel = functools.partial(_mlp_kernel, chunk_b=chunk_b, n_chunks=n_chunks,
                               mxu_dtype=mxu_dtype)

    out_packed = pl.pallas_call(
        kernel,
        out_shape=jax.ShapeDtypeStruct((bp_pad, out_p), x.dtype),
        grid_spec=pltpu.PrefetchScalarGridSpec(
            num_scalar_prefetch=0,
            grid=grid,
            in_specs=[
                pl.BlockSpec((tile_b, in_p), lambda i: (i, 0)),
                resident((in_p, hid_p)), resident((1, hid_p)),
                resident((hid_p, hid_p)), resident((1, hid_p)),
                resident((hid_p, hid_p)), resident((1, hid_p)),
                resident((hid_p, out_p)), resident((1, out_p)),
            ],
            out_specs=pl.BlockSpec((tile_b, out_p), lambda i: (i, 0)),
        ),
        compiler_params=pltpu.CompilerParams(
            dimension_semantics=("parallel",),   # megacore sharding when grid >= 2
            vmem_limit_bytes=32 * 1024 * 1024,
        ),
    )(xp, w1p, b1p, w2p, b2p, w3p, b3p, w4p, b4p)

    # Unpack rows; each packed row holds `pack` consecutive samples' outputs.
    return out_packed.reshape(b_pad, output_dim)[:B]


def init_params(key, input_dim, hidden_dim, output_dim):
    """Deterministic init mimicking PyTorch nn.Linear default (uniform +/- 1/sqrt(fan_in))."""
    dims = [(input_dim, hidden_dim),
            (hidden_dim, hidden_dim),
            (hidden_dim, hidden_dim),
            (hidden_dim, output_dim)]
    params = []
    for (fan_in, fan_out) in dims:
        key, kw, kb = jax.random.split(key, 3)
        bound = 1.0 / jnp.sqrt(fan_in)
        w = jax.random.uniform(kw, (fan_in, fan_out), jnp.float32, -bound, bound)
        b = jax.random.uniform(kb, (1, fan_out), jnp.float32, -bound, bound)
        params.append((w, b))
    return params


def reference_forward(x, params):
    h = x
    for idx, (w, b) in enumerate(params):
        h = h @ w + b
        if idx < len(params) - 1:
            h = jnp.tanh(h)
    return h


if __name__ == "__main__":
    # Small shapes consistent with the module: 3D coords -> hidden 32 -> 4 outputs (u, v, w, p).
    input_dim, hidden_dim, output_dim = 3, 32, 4

    key = jax.random.PRNGKey(0)
    key, kx1, kx2 = jax.random.split(key, 3)
    params = init_params(key, input_dim, hidden_dim, output_dim)

    # 1) Small batch not divisible by the pack factor (exercises pack/row padding).
    x1 = jax.random.normal(kx1, (18, input_dim), jnp.float32)
    out1 = jax.block_until_ready(physics_informed_nn_forward(x1, params))
    ref1 = reference_forward(x1, params)
    assert out1.shape == (18, output_dim)
    assert jnp.allclose(out1, ref1, atol=1e-5, rtol=1e-5), "mismatch vs pure-JAX reference (small)"

    # 2) Ragged batch exercising batch padding, grid > 1 (both v7x cores) and tiling logic.
    x2 = jax.random.normal(kx2, (300, input_dim), jnp.float32)
    out2 = jax.block_until_ready(physics_informed_nn_forward(x2, params))
    ref2 = reference_forward(x2, params)
    assert out2.shape == (300, output_dim)
    assert jnp.allclose(out2, ref2, atol=1e-5, rtol=1e-5), "mismatch vs pure-JAX reference (ragged)"

    # 3) Opt-in bf16 MXU-operand path (f32 accumulation, f32 tanh/bias) — looser tolerance.
    out3 = jax.block_until_ready(
        physics_informed_nn_forward(x2, params, mxu_dtype=jnp.bfloat16))
    assert jnp.allclose(out3, ref2, atol=5e-2, rtol=5e-2), "mismatch vs pure-JAX reference (bf16)"

    print("KERNEL_OK")
</pallas_src>

<mosaic_0001>
module attributes {stable_mosaic.version = 11 : i64} {
  func.func @_mlp_kernel(%arg0: i32, %arg1: memref<8x12xf32, #tpu.memory_space<vmem>>, %arg2: memref<12x128xf32, #tpu.memory_space<vmem>>, %arg3: memref<1x128xf32, #tpu.memory_space<vmem>>, %arg4: memref<128x128xf32, #tpu.memory_space<vmem>>, %arg5: memref<1x128xf32, #tpu.memory_space<vmem>>, %arg6: memref<128x128xf32, #tpu.memory_space<vmem>>, %arg7: memref<1x128xf32, #tpu.memory_space<vmem>>, %arg8: memref<128x16xf32, #tpu.memory_space<vmem>>, %arg9: memref<1x16xf32, #tpu.memory_space<vmem>>, %arg10: memref<8x16xf32, #tpu.memory_space<vmem>>) attributes {dimension_semantics = [#tpu.dimension_semantics<parallel>], iteration_bounds = array<i64: 1>, scalar_prefetch = 0 : i64, scratch_operands = 0 : i64, tpu.core_type = #tpu.core_type<tc>, window_params = [{transform_indices = @transform_0, window_bounds = array<i64: 8, 12>}, {pipeline_mode = #tpu.pipeline_mode<synchronous>, transform_indices = @transform_1, window_bounds = array<i64: 12, 128>}, {pipeline_mode = #tpu.pipeline_mode<synchronous>, transform_indices = @transform_2, window_bounds = array<i64: 1, 128>}, {pipeline_mode = #tpu.pipeline_mode<synchronous>, transform_indices = @transform_3, window_bounds = array<i64: 128, 128>}, {pipeline_mode = #tpu.pipeline_mode<synchronous>, transform_indices = @transform_4, window_bounds = array<i64: 1, 128>}, {pipeline_mode = #tpu.pipeline_mode<synchronous>, transform_indices = @transform_5, window_bounds = array<i64: 128, 128>}, {pipeline_mode = #tpu.pipeline_mode<synchronous>, transform_indices = @transform_6, window_bounds = array<i64: 1, 128>}, {pipeline_mode = #tpu.pipeline_mode<synchronous>, transform_indices = @transform_7, window_bounds = array<i64: 128, 16>}, {pipeline_mode = #tpu.pipeline_mode<synchronous>, transform_indices = @transform_8, window_bounds = array<i64: 1, 16>}, {transform_indices = @transform_9, window_bounds = array<i64: 8, 16>}]} {
    %c0 = arith.constant 0 : index
    %c0_0 = arith.constant 0 : index
    %0 = vector.load %arg2[%c0, %c0_0] : memref<12x128xf32, #tpu.memory_space<vmem>>, vector<12x128xf32>
    %c0_1 = arith.constant 0 : index
    %c0_2 = arith.constant 0 : index
    %1 = vector.load %arg3[%c0_1, %c0_2] : memref<1x128xf32, #tpu.memory_space<vmem>>, vector<1x128xf32>
    %c0_3 = arith.constant 0 : index
    %c0_4 = arith.constant 0 : index
    %2 = vector.load %arg4[%c0_3, %c0_4] : memref<128x128xf32, #tpu.memory_space<vmem>>, vector<128x128xf32>
    %c0_5 = arith.constant 0 : index
    %c0_6 = arith.constant 0 : index
    %3 = vector.load %arg5[%c0_5, %c0_6] : memref<1x128xf32, #tpu.memory_space<vmem>>, vector<1x128xf32>
    %c0_7 = arith.constant 0 : index
    %c0_8 = arith.constant 0 : index
    %4 = vector.load %arg6[%c0_7, %c0_8] : memref<128x128xf32, #tpu.memory_space<vmem>>, vector<128x128xf32>
    %c0_9 = arith.constant 0 : index
    %c0_10 = arith.constant 0 : index
    %5 = vector.load %arg7[%c0_9, %c0_10] : memref<1x128xf32, #tpu.memory_space<vmem>>, vector<1x128xf32>
    %c0_11 = arith.constant 0 : index
    %c0_12 = arith.constant 0 : index
    %6 = vector.load %arg8[%c0_11, %c0_12] : memref<128x16xf32, #tpu.memory_space<vmem>>, vector<128x16xf32>
    %c0_13 = arith.constant 0 : index
    %c0_14 = arith.constant 0 : index
    %7 = vector.load %arg9[%c0_13, %c0_14] : memref<1x16xf32, #tpu.memory_space<vmem>>, vector<1x16xf32>
    %c0_i32 = arith.constant 0 : i32
    %c8_i32 = arith.constant 8 : i32
    %8 = arith.muli %c0_i32, %c8_i32 : i32
    %9 = tpu.assume_multiple %8, 8 : i32
    %10 = arith.index_cast %9 : i32 to index
    %c0_15 = arith.constant 0 : index
    %11 = vector.load %arg1[%10, %c0_15] : memref<8x12xf32, #tpu.memory_space<vmem>>, vector<8x12xf32>
    %cst = arith.constant dense<0.000000e+00> : vector<8x128xf32>
    %12 = tpu.matmul %11, %0, %cst {dimension_numbers = #tpu.dot_dimension_numbers<[1], [0], [0], [1], [0, 0, 1, 1], [], []>} : vector<8x12xf32>, vector<12x128xf32>, vector<8x128xf32> -> vector<8x128xf32>
    %13 = vector.broadcast %1 : vector<1x128xf32> to vector<8x128xf32>
    %14 = arith.addf %12, %13 : vector<8x128xf32>
    %15 = math.tanh %14 : vector<8x128xf32>
    %cst_16 = arith.constant dense<0.000000e+00> : vector<8x128xf32>
    %16 = tpu.matmul %15, %2, %cst_16 {dimension_numbers = #tpu.dot_dimension_numbers<[1], [0], [0], [1], [0, 0, 1, 1], [], []>} : vector<8x128xf32>, vector<128x128xf32>, vector<8x128xf32> -> vector<8x128xf32>
    %17 = vector.broadcast %3 : vector<1x128xf32> to vector<8x128xf32>
    %18 = arith.addf %16, %17 : vector<8x128xf32>
    %19 = math.tanh %18 : vector<8x128xf32>
    %cst_17 = arith.constant dense<0.000000e+00> : vector<8x128xf32>
    %20 = tpu.matmul %19, %4, %cst_17 {dimension_numbers = #tpu.dot_dimension_numbers<[1], [0], [0], [1], [0, 0, 1, 1], [], []>} : vector<8x128xf32>, vector<128x128xf32>, vector<8x128xf32> -> vector<8x128xf32>
    %21 = vector.broadcast %5 : vector<1x128xf32> to vector<8x128xf32>
    %22 = arith.addf %20, %21 : vector<8x128xf32>
    %23 = math.tanh %22 : vector<8x128xf32>
    %cst_18 = arith.constant dense<0.000000e+00> : vector<8x16xf32>
    %24 = tpu.matmul %23, %6, %cst_18 {dimension_numbers = #tpu.dot_dimension_numbers<[1], [0], [0], [1], [0, 0, 1, 1], [], []>} : vector<8x128xf32>, vector<128x16xf32>, vector<8x16xf32> -> vector<8x16xf32>
    %25 = vector.broadcast %7 : vector<1x16xf32> to vector<8x16xf32>
    %26 = arith.addf %24, %25 : vector<8x16xf32>
    %27 = arith.index_cast %9 : i32 to index
    %c0_19 = arith.constant 0 : index
    %28 = vector.load %arg10[%27, %c0_19] : memref<8x16xf32, #tpu.memory_space<vmem>>, vector<8x16xf32>
    tpu.vector_store %arg10[%27, %c0_19], %26 {strides = array<i32>} : memref<8x16xf32, #tpu.memory_space<vmem>>, vector<8x16xf32>,
    %c1_i32 = arith.constant 1 : i32
    return
  }
  func.func @transform_0(%arg0: i32) -> (i32, i32) {
    %c0_i32 = arith.constant 0 : i32
    %c0_i32_0 = arith.constant 0 : i32
    return %arg0, %c0_i32 : i32, i32
  }
  func.func @transform_1(%arg0: i32) -> (i32, i32) {
    %c0_i32 = arith.constant 0 : i32
    %c0_i32_0 = arith.constant 0 : i32
    %c0_i32_1 = arith.constant 0 : i32
    return %c0_i32, %c0_i32_0 : i32, i32
  }
  func.func @transform_2(%arg0: i32) -> (i32, i32) {
    %c0_i32 = arith.constant 0 : i32
    %c0_i32_0 = arith.constant 0 : i32
    %c0_i32_1 = arith.constant 0 : i32
    return %c0_i32, %c0_i32_0 : i32, i32
  }
  func.func @transform_3(%arg0: i32) -> (i32, i32) {
    %c0_i32 = arith.constant 0 : i32
    %c0_i32_0 = arith.constant 0 : i32
    %c0_i32_1 = arith.constant 0 : i32
    return %c0_i32, %c0_i32_0 : i32, i32
  }
  func.func @transform_4(%arg0: i32) -> (i32, i32) {
    %c0_i32 = arith.constant 0 : i32
    %c0_i32_0 = arith.constant 0 : i32
    %c0_i32_1 = arith.constant 0 : i32
    return %c0_i32, %c0_i32_0 : i32, i32
  }
  func.func @transform_5(%arg0: i32) -> (i32, i32) {
    %c0_i32 = arith.constant 0 : i32
    %c0_i32_0 = arith.constant 0 : i32
    %c0_i32_1 = arith.constant 0 : i32
    return %c0_i32, %c0_i32_0 : i32, i32
  }
  func.func @transform_6(%arg0: i32) -> (i32, i32) {
    %c0_i32 = arith.constant 0 : i32
    %c0_i32_0 = arith.constant 0 : i32
    %c0_i32_1 = arith.constant 0 : i32
    return %c0_i32, %c0_i32_0 : i32, i32
  }
  func.func @transform_7(%arg0: i32) -> (i32, i32) {
    %c0_i32 = arith.constant 0 : i32
    %c0_i32_0 = arith.constant 0 : i32
    %c0_i32_1 = arith.constant 0 : i32
    return %c0_i32, %c0_i32_0 : i32, i32
  }
  func.func @transform_8(%arg0: i32) -> (i32, i32) {
    %c0_i32 = arith.constant 0 : i32
    %c0_i32_0 = arith.constant 0 : i32
    %c0_i32_1 = arith.constant 0 : i32
    return %c0_i32, %c0_i32_0 : i32, i32
  }
  func.func @transform_9(%arg0: i32) -> (i32, i32) {
    %c0_i32 = arith.constant 0 : i32
    %c0_i32_0 = arith.constant 0 : i32
    return %arg0, %c0_i32 : i32, i32
  }
}

</mosaic_0001>

<bundles_post_ra>
// kernel: tpu_custom_call.1
= control target key start
LH: loop header
LB: loop body
LE: loop exit
PB: predicated region body
PF: predicated region fallthrough
CT: control target
= control target key end

     0   :  { %14 = vsyncpa [#allocation3], 0  ;;  %s936_s0 = inlined_call_operand.hbm [shape: f32[8,12], index: 0, kind: input, shape index: {}]   ;;  %s937_s1 = inlined_call_operand.vmem [shape: f32[12,128], index: 1, kind: input, shape index: {}]   ;;  %s938_s2 = inlined_call_operand.vmem [shape: f32[1,128], index: 2, kind: input, shape index: {}]   ;;  %s939_s3 = inlined_call_operand.vmem [shape: f32[128,128], index: 3, kind: input, shape index: {}]   ;;  %s940_s4 = inlined_call_operand.vmem [shape: f32[1,128], index: 4, kind: input, shape index: {}]   ;;  %s941_s5 = inlined_call_operand.hbm [shape: f32[128,128], index: 5, kind: input, shape index: {}]   ;;  %s942_s6 = inlined_call_operand.vmem [shape: f32[1,128], index: 6, kind: input, shape index: {}]   ;;  %s943_s7 = inlined_call_operand.vmem [shape: f32[128,16], index: 7, kind: input, shape index: {}]   ;;  %s944_s8 = inlined_call_operand.vmem [shape: f32[1,16], index: 8, kind: input, shape index: {}]   ;;  %s945_s9 = inlined_call_operand.hbm [shape: f32[8,16], index: 9, kind: output, shape index: {}]  }
   0x1   :  { %15 = vsyncpa [#allocation6], 0 }
   0x2   :  { %16 = vsyncpa [#allocation4], 0  ;;  %s698_s30 = smov [#allocation2]   ;;  %s699_s11 = smov [#allocation5]  }
   0x3   :  { %s23_s10 = sshll.u32 %s698_s30, 4  ;;  %s40_s12 = sshll.u32 %s699_s11, 4  ;;  %s24_s10 = int_to_ptr.vmem [resolvable:$true] %s23_s10  ;;  %s41_s12 = int_to_ptr.vmem [resolvable:$true] %s40_s12 }
   0x4   :  { %s640_s13 = scalar_lea.vmem %s24_s10, 128  ;;  %p645_p1 = scmp.lt.s32.totalorder %s24_s10, %s24_s10 }
   0x5   :  { %p641_p0 = scmp.ne.s32.totalorder %s24_s10, %s640_s13  ;;  %p646_p2 = scmp.lt.s32.totalorder %s640_s13, %s640_s13 }
   0x7   :  { %p647_p3 = por %p646_p2, %p645_p1 }
   0x9   :  { %p648_p4 = pnand %p647_p3, %p641_p0 }
   0xb   :  { %651 = shalt.err (!%p648_p4)
}
   0xc   :  { %26 = dma.hbm_to_vmem [thread:$0]  %s936_s0, 128, %s24_s10, [#allocation3]  }
   0xd   :  { %s660_s16 = scalar_lea.vmem %s41_s12, 2048  ;;  %p665_p6 = scmp.lt.s32.totalorder %s41_s12, %s41_s12 }
   0xe   :  { %p661_p5 = scmp.ne.s32.totalorder %s41_s12, %s660_s16  ;;  %p666_p7 = scmp.lt.s32.totalorder %s660_s16, %s660_s16 }
  0x10   :  { %p667_p8 = por %p666_p7, %p665_p6 }
  0x12   :  { %p668_p9 = pnand %p667_p8, %p661_p5 }
  0x14   :  { %671 = shalt.err (!%p668_p9)
}
  0x15   :  { %s700_s17 = smov 128   ;;  %s701_s18 = smov 8  }
  0x16   :  { %46 = dma.hbm_to_vmem [thread:$0]  %s941_s5, 2048, %s41_s12, [#allocation6], %s700_s17, %s700_s17, %s701_s18  }
  0x17   :  { %692 = dma.done.wait [#allocation3], 128  }
  0x18   :  { %693 = vsyncadd [#allocation3], 4294967168 }
  0x19   :  { %694 = dma.done.wait [#allocation6], 2048  }
  0x1a   :  { %695 = vsyncadd [#allocation6], 4294965248  ;;  %v702_v0 = vmov 0.0   ;;  %vm703_vm0 = vmmov 0   ;;  %vm124_vm1 = vcmask 1043456   ;;  %v59_v2 = vld [vmem:[%s937_s1] sm:$0xff] }
  0x1b   :  { %507 = vmatprep.subr.mxu0 %v702_v0  ;;  %511 = vmatprep.mubr.msk.f32.mxu0 %vm703_vm0, %v702_v0  ;;  %v60_v1 = vld [vmem:[%s937_s1 + $0x8] sm:$0xf]  ;;  %v113_v3 = vld [vmem:[#allocation2] sm:$0xff]  ;;  %vm120_vm2 = vcmask 97280   ;;  %v77_v4 = vld [vmem:[%s939_s3 + $0x78] sm:$0xff]  ;;  %s704_s20 = smov [#allocation7]  }
  0x1c   :  { %514 = vmatprep.subr.mxu1 %v702_v0  ;;  %546 = vmatprep.mubr.msk.f32.mxu1 %vm703_vm0, %v702_v0  ;;  %v76_v5 = vld [vmem:[%s939_s3 + $0x70] sm:$0xff]  ;;  %v75_v6 = vld [vmem:[%s939_s3 + $0x68] sm:$0xff]  ;;  %v74_v7 = vld [vmem:[%s939_s3 + $0x60] sm:$0xff]  ;;  %vm429_vm3 = vcmask 130048  }
  0x1d   :  { %508 = vmatpush3.msk.msra.mxu0 %vm124_vm1, %v60_v1  ;;  %515 = vmatpush3.msra.mxu1 %v77_v4  ;;  %v73_v8 = vld [vmem:[%s939_s3 + $0x58] sm:$0xff]  ;;  %v72_v9 = vld [vmem:[%s939_s3 + $0x50] sm:$0xff]  ;;  %v71_v10 = vld [vmem:[%s939_s3 + $0x48] sm:$0xff] }
  0x1e   :  { %509 = vmatprep.subr.mxu0 %v702_v0  ;;  %516 = vmatprep.subr.mxu1 %v702_v0  ;;  %v70_v11 = vld [vmem:[%s939_s3 + $0x40] sm:$0xff]  ;;  %v69_v12 = vld [vmem:[%s939_s3 + $0x38] sm:$0xff]  ;;  %v68_v13 = vld [vmem:[%s939_s3 + $0x30] sm:$0xff] }
  0x1f   :  { %510 = vmatpush3.msra.mxu0 %v59_v2  ;;  %517 = vmatpush3.msra.mxu1 %v76_v5  ;;  %v67_v14 = vld [vmem:[%s939_s3 + $0x28] sm:$0xff]  ;;  %v66_v15 = vld [vmem:[%s939_s3 + $0x20] sm:$0xff]  ;;  %v65_v16 = vld [vmem:[%s939_s3 + $0x18] sm:$0xff] }
  0x20   :  { %512 = vmatmul.mubr.msk.f32.vlgmr.msra.gmra.mxu0 %vm120_vm2, %v113_v3  ;;  %518 = vmatprep.subr.mxu1 %v702_v0  ;;  %v64_v17 = vld [vmem:[%s939_s3 + $0x10] sm:$0xff]  ;;  %v63_v18 = vld [vmem:[%s939_s3 + $0x8] sm:$0xff]  ;;  %v62_v19 = vld [vmem:[%s939_s3] sm:$0xff] }
  0x21   :  { %549 = vmatprep.subr.mxu0 %v702_v0  ;;  %519 = vmatpush3.msra.mxu1 %v75_v6  ;;  %v94_v20 = vld [vmem:[#allocation5 + $0x78] sm:$0xff]  ;;  %v93_v21 = vld [vmem:[#allocation5 + $0x70] sm:$0xff]  ;;  %v92_v22 = vld [vmem:[#allocation5 + $0x68] sm:$0xff] }
  0x22   :  { %581 = vmatprep.mubr.msk.f32.mxu0 %vm703_vm0, %v702_v0  ;;  %520 = vmatprep.subr.mxu1 %v702_v0  ;;  %v91_v23 = vld [vmem:[#allocation5 + $0x60] sm:$0xff]  ;;  %v90_v24 = vld [vmem:[#allocation5 + $0x58] sm:$0xff]  ;;  %v89_v25 = vld [vmem:[#allocation5 + $0x50] sm:$0xff] }
  0x23   :  { %521 = vmatpush3.msra.mxu1 %v74_v7  ;;  %550 = vmatpush3.msra.mxu0 %v94_v20  ;;  %v88_v26 = vld [vmem:[#allocation5 + $0x48] sm:$0xff]  ;;  %v447_v27 = vld [vmem:[%s938_s2] ss:$0 sm:$0xff]  ;;  %v87_v32 = vld [vmem:[#allocation5 + $0x40] sm:$0xff] }
  0x24   :  { %522 = vmatprep.subr.mxu1 %v702_v0  ;;  %551 = vmatprep.subr.mxu0 %v702_v0  ;;  %v86_v33 = vld [vmem:[#allocation5 + $0x38] sm:$0xff]  ;;  %v85_v34 = vld [vmem:[#allocation5 + $0x30] sm:$0xff]  ;;  %v84_v35 = vld [vmem:[#allocation5 + $0x28] sm:$0xff] }
  0x25   :  { %523 = vmatpush3.msra.mxu1 %v73_v8  ;;  %552 = vmatpush3.msra.mxu0 %v93_v21  ;;  %v83_v36 = vld [vmem:[#allocation5 + $0x20] sm:$0xff]  ;;  %v82_v37 = vld [vmem:[#allocation5 + $0x18] sm:$0xff]  ;;  %v81_v38 = vld [vmem:[#allocation5 + $0x10] sm:$0xff] }
  0x26   :  { %524 = vmatprep.subr.mxu1 %v702_v0  ;;  %553 = vmatprep.subr.mxu0 %v702_v0  ;;  %v80_v39 = vld [vmem:[#allocation5 + $0x8] sm:$0xff]  ;;  %v79_v40 = vld [vmem:[#allocation5] sm:$0xff]  ;;  %v111_v41 = vld [vmem:[%s943_s7 + $0x78] sm:$0xff] }
  0x27   :  { %525 = vmatpush3.msra.mxu1 %v72_v9  ;;  %554 = vmatpush3.msra.mxu0 %v92_v22  ;;  %v110_v42 = vld [vmem:[%s943_s7 + $0x70] sm:$0xff]  ;;  %v109_v43 = vld [vmem:[%s943_s7 + $0x68] sm:$0xff]  ;;  %v108_v44 = vld [vmem:[%s943_s7 + $0x60] sm:$0xff] }
  0x28   :  { %526 = vmatprep.subr.mxu1 %v702_v0  ;;  %555 = vmatprep.subr.mxu0 %v702_v0  ;;  %v107_v45 = vld [vmem:[%s943_s7 + $0x58] sm:$0xff]  ;;  %v106_v46 = vld [vmem:[%s943_s7 + $0x50] sm:$0xff]  ;;  %v105_v47 = vld [vmem:[%s943_s7 + $0x48] sm:$0xff] }
  0x29   :  { %527 = vmatpush3.msra.mxu1 %v71_v10  ;;  %556 = vmatpush3.msra.mxu0 %v91_v23  ;;  %v450_v48 = vld [vmem:[%s940_s4] ss:$0 sm:$0xff]  ;;  %v103_v54 = vld [vmem:[%s943_s7 + $0x38] sm:$0xff]  ;;  %v102_v55 = vld [vmem:[%s943_s7 + $0x30] sm:$0xff] }
  0x2a   :  { %528 = vmatprep.subr.mxu1 %v702_v0  ;;  %557 = vmatprep.subr.mxu0 %v702_v0  ;;  %v104_v53 = vld [vmem:[%s943_s7 + $0x40] sm:$0xff]  ;;  %v101_v56 = vld [vmem:[%s943_s7 + $0x28] sm:$0xff]  ;;  %v99_v58 = vld [vmem:[%s943_s7 + $0x18] sm:$0xff] }
  0x2b   :  { %529 = vmatpush3.msra.mxu1 %v70_v11  ;;  %558 = vmatpush3.msra.mxu0 %v90_v24  ;;  %v100_v57 = vld [vmem:[%s943_s7 + $0x20] sm:$0xff]  ;;  %v98_v59 = vld [vmem:[%s943_s7 + $0x10] sm:$0xff]  ;;  %v97_v60 = vld [vmem:[%s943_s7 + $0x8] sm:$0xff] }
  0x2c   :  { %530 = vmatprep.subr.mxu1 %v702_v0  ;;  %559 = vmatprep.subr.mxu0 %v702_v0  ;;  %v96_v61 = vld [vmem:[%s943_s7] sm:$0xff]  ;;  %s437_s7 = sshll.u32 %s704_s20, 4  ;;  %s438_s7 = int_to_ptr.vmem [resolvable:$true] %s437_s7 }
  0x2d   :  { %531 = vmatpush3.msra.mxu1 %v69_v12  ;;  %560 = vmatpush3.msra.mxu0 %v89_v25  ;;  %v451_v62 = vld [vmem:[%s942_s6] ss:$0 sm:$0xff]  ;;  %s672_s0 = scalar_lea.vmem %s438_s7, 128  ;;  %p677_p11 = scmp.lt.s32.totalorder %s438_s7, %s438_s7 }
  0x2e   :  { %532 = vmatprep.subr.mxu1 %v702_v0  ;;  %561 = vmatprep.subr.mxu0 %v702_v0  ;;  %v452_v4 = vld [vmem:[%s944_s8] ss:$0 sm:$0xff]  ;;  %p673_p10 = scmp.ne.s32.totalorder %s438_s7, %s672_s0  ;;  %p678_p12 = scmp.lt.s32.totalorder %s672_s0, %s672_s0 }
  0x2f   :  { %533 = vmatpush3.msra.mxu1 %v68_v13  ;;  %562 = vmatpush3.msra.mxu0 %v88_v26 }
  0x30   :  { %534 = vmatprep.subr.mxu1 %v702_v0  ;;  %563 = vmatprep.subr.mxu0 %v702_v0  ;;  %p679_p13 = por %p678_p12, %p677_p11 }
  0x31   :  { %535 = vmatpush3.msra.mxu1 %v67_v14  ;;  %564 = vmatpush3.msra.mxu0 %v87_v32 }
  0x32   :  { %536 = vmatprep.subr.mxu1 %v702_v0  ;;  %565 = vmatprep.subr.mxu0 %v702_v0  ;;  %p680_p0 = pnand %p679_p13, %p673_p10 }
  0x33   :  { %537 = vmatpush3.msra.mxu1 %v66_v15  ;;  %566 = vmatpush3.msra.mxu0 %v86_v33 }
  0x34   :  { %538 = vmatprep.subr.mxu1 %v702_v0  ;;  %567 = vmatprep.subr.mxu0 %v702_v0 }
  0x35   :  { %539 = vmatpush3.msra.mxu1 %v65_v16  ;;  %568 = vmatpush3.msra.mxu0 %v85_v34 }
  0x36   :  { %540 = vmatprep.subr.mxu1 %v702_v0  ;;  %569 = vmatprep.subr.mxu0 %v702_v0 }
  0x37   :  { %541 = vmatpush3.msra.mxu1 %v64_v17  ;;  %570 = vmatpush3.msra.mxu0 %v84_v35 }
  0x38   :  { %542 = vmatprep.subr.mxu1 %v702_v0  ;;  %571 = vmatprep.subr.mxu0 %v702_v0 }
  0x39   :  { %543 = vmatpush3.msra.mxu1 %v63_v18  ;;  %572 = vmatpush3.msra.mxu0 %v83_v36 }
  0x3a   :  { %544 = vmatprep.subr.mxu1 %v702_v0  ;;  %573 = vmatprep.subr.mxu0 %v702_v0 }
  0x3b   :  { %545 = vmatpush3.msra.mxu1 %v62_v19  ;;  %574 = vmatpush3.msra.mxu0 %v82_v37 }
  0x3c   :  { %584 = vmatprep.subr.mxu1 %v702_v0  ;;  %575 = vmatprep.subr.mxu0 %v702_v0 }
  0x3d   :  { %576 = vmatpush3.msra.mxu0 %v81_v38 }
  0x3e   :  { %577 = vmatprep.subr.mxu0 %v702_v0 }
  0x3f   :  { %578 = vmatpush3.msra.mxu0 %v80_v39 }
  0x40   :  { %579 = vmatprep.subr.mxu0 %v702_v0 }
  0x41   :  { %580 = vmatpush3.msra.mxu0 %v79_v40 }
  0xe0   :  { %v194_v28 = vpop.f32.mrf.mxu0 }
  0xe1   :  { %v195_v29 = vadd.f32 %v447_v27, %v194_v28 }
  0xe2   :  { %v513_v30 = vpop.f32.mrf.mxu0 }
  0xe3   :  { %626 = vtanh.f32 %v195_v29 }
  0xf0   :  { %v627_v31 = vpop.eup %626 }
  0xf1   :  { %547 = vmatmul.mubr.f32.vlgmr.msra.gmra.mxu1 %v627_v31 }
  0xf2   :  { %616 = vmatprep.mubr.msk.f32.mxu1 %vm703_vm0, %v702_v0  ;;  %585 = vmatpush3.msra.mxu1 %v111_v41 }
  0xf3   :  { %586 = vmatprep.subr.mxu1 %v702_v0 }
  0xf4   :  { %587 = vmatpush3.msra.mxu1 %v110_v42 }
  0xf5   :  { %588 = vmatprep.subr.mxu1 %v702_v0 }
  0xf6   :  { %589 = vmatpush3.msra.mxu1 %v109_v43 }
  0xf7   :  { %590 = vmatprep.subr.mxu1 %v702_v0 }
  0xf8   :  { %591 = vmatpush3.msra.mxu1 %v108_v44 }
  0xf9   :  { %592 = vmatprep.subr.mxu1 %v702_v0 }
  0xfa   :  { %593 = vmatpush3.msra.mxu1 %v107_v45 }
  0xfb   :  { %594 = vmatprep.subr.mxu1 %v702_v0 }
  0xfc   :  { %595 = vmatpush3.msra.mxu1 %v106_v46 }
  0xfd   :  { %596 = vmatprep.subr.mxu1 %v702_v0 }
  0xfe   :  { %597 = vmatpush3.msra.mxu1 %v105_v47 }
  0xff   :  { %598 = vmatprep.subr.mxu1 %v702_v0 }
 0x100   :  { %599 = vmatpush3.msra.mxu1 %v104_v53 }
 0x101   :  { %600 = vmatprep.subr.mxu1 %v702_v0 }
 0x102   :  { %601 = vmatpush3.msra.mxu1 %v103_v54 }
 0x103   :  { %602 = vmatprep.subr.mxu1 %v702_v0 }
 0x104   :  { %603 = vmatpush3.msra.mxu1 %v102_v55 }
 0x105   :  { %604 = vmatprep.subr.mxu1 %v702_v0 }
 0x106   :  { %605 = vmatpush3.msra.mxu1 %v101_v56 }
 0x107   :  { %606 = vmatprep.subr.mxu1 %v702_v0 }
 0x108   :  { %607 = vmatpush3.msra.mxu1 %v100_v57 }
 0x109   :  { %608 = vmatprep.subr.mxu1 %v702_v0 }
 0x10a   :  { %609 = vmatpush3.msra.mxu1 %v99_v58 }
 0x10b   :  { %610 = vmatprep.subr.mxu1 %v702_v0 }
 0x10c   :  { %611 = vmatpush3.msra.mxu1 %v98_v59 }
 0x10d   :  { %612 = vmatprep.subr.mxu1 %v702_v0 }
 0x10e   :  { %613 = vmatpush3.msra.mxu1 %v97_v60 }
 0x10f   :  { %614 = vmatprep.subr.mxu1 %v702_v0 }
 0x110   :  { %615 = vmatpush3.msra.mxu1 %v96_v61 }
 0x1b1   :  { %v271_v49 = vpop.f32.mrf.mxu1 }
 0x1b2   :  { %v272_v50 = vadd.f32 %v450_v48, %v271_v49 }
 0x1b3   :  { %v548_v51 = vpop.f32.mrf.mxu1 }
 0x1b4   :  { %628 = vtanh.f32 %v272_v50 }
 0x1c1   :  { %v629_v52 = vpop.eup %628 }
 0x1c2   :  { %582 = vmatmul.mubr.f32.vlgmr.msra.gmra.mxu0 %v629_v52 }
 0x282   :  { %v348_v63 = vpop.f32.mrf.mxu0 }
 0x283   :  { %v349_v1 = vadd.f32 %v451_v62, %v348_v63 }
 0x284   :  { %v583_v2 = vpop.f32.mrf.mxu0 }
 0x285   :  { %630 = vtanh.f32 %v349_v1 }
 0x292   :  { %v631_v3 = vpop.eup %630 }
 0x293   :  { %617 = vmatmul.mubr.f32.vlgmr.msra.gmra.mxu1 %v631_v3 }
 0x353   :  { %v425_v5 = vpop.f32.mrf.mxu1 }
 0x354   :  { %v426_v0 = vadd.f32 %v452_v4, %v425_v5 }
 0x355   :  { %v618_v6 = vpop.f32.mrf.mxu1 }
 0x356   :  { %430 = vst.msk [vmem:[#allocation7] sm:$0xff] %vm429_vm3, %v426_v0 }
 0x357   :  { %683 = shalt.err (!%p680_p0)
}
 0x358   :  { %440 = dma.vmem_to_hbm [thread:$0]  %s438_s7, 128, %s945_s9, [#allocation4]  }
 0x359   :  { %696 = dma.done.wait [#allocation4], 128  }
 0x35a   :  { %697 = vsyncadd [#allocation4], 4294967168 }
 0x35b   :  { %444 = vsyncpa [#allocation3], 1 }
 0x35c   :  { %445 = vsyncpa [#allocation6], 1 }
 0x35d   :  { %446 = vsyncpa [#allocation4], 1 }

</bundles_post_ra>
